<compile_context>
chip_gen: v6e
topology: v6e:2x2x1
jax: 0.10.0
libtpu: 0.0.40
codegen_flags: <defaults>
</compile_context>

<pallas_src>
import functools

import jax
import jax.numpy as jnp
from jax.experimental import pallas as pl
from jax.experimental.pallas import tpu as pltpu


def _round_up(x: int, m: int) -> int:
    return ((x + m - 1) // m) * m


def logreg_kernel(x_ref, wt_ref, b_ref, o_ref, acc_ref):
    """One (tm, tn) output tile, accumulated over the K (input feature) grid axis."""
    k = pl.program_id(2)

    @pl.when(k == 0)
    def _init():
        acc_ref[...] = jnp.zeros_like(acc_ref)

    # MXU matmul: bf16 operands, f32 accumulation.
    acc_ref[...] += jnp.dot(
        x_ref[...].astype(jnp.bfloat16),
        wt_ref[...].astype(jnp.bfloat16),
        preferred_element_type=jnp.float32,
    )

    @pl.when(k == pl.num_programs(2) - 1)
    def _finalize():
        # Bias add + sigmoid epilogue in f32 (v5e has no bf16 VPU/EUP), cast at store.
        logits = acc_ref[...] + b_ref[...]
        o_ref[...] = jax.nn.sigmoid(logits).astype(o_ref.dtype)


@functools.partial(jax.jit, static_argnames=("tm", "tn", "tk"))
def logistic_regression_forward(x, w, b, *, tm=256, tn=256, tk=512):
    """x: (B, D) f32, w: (O, D) f32 (torch.nn.Linear layout), b: (O,) f32 -> (B, O) f32."""
    B, D = x.shape
    O = w.shape[0]

    # Pre-transpose the weight once outside the kernel: (O, D) -> (D, O).
    wt = w.T

    # Tile sizes: cap targets by the (aligned) problem dims so tiny problems stay tiny.
    tm = min(tm, _round_up(B, 8))     # sublane axis of X / output rows
    tk = min(tk, _round_up(D, 128))   # lane axis of X, sublane axis of W^T
    tn = min(tn, _round_up(O, 128))   # lane axis of W^T / output (lane-dense, >=128)

    Bp = _round_up(B, tm)
    Dp = _round_up(D, tk)
    Op = _round_up(O, tn)

    # Zero-pad to tile multiples. Padded D columns are zero in both X and W^T, so they
    # contribute nothing to the accumulation; padded B rows / O columns are sliced off.
    x_p = jnp.pad(x, ((0, Bp - B), (0, Dp - D)))
    wt_p = jnp.pad(wt, ((0, Dp - D), (0, Op - O)))
    b_p = jnp.pad(b, (0, Op - O)).reshape(1, Op)

    grid = (Bp // tm, Op // tn, Dp // tk)

    out_p = pl.pallas_call(
        logreg_kernel,
        out_shape=jax.ShapeDtypeStruct((Bp, Op), jnp.float32),
        grid=grid,
        in_specs=[
            pl.BlockSpec((tm, tk), lambda i, j, k: (i, k)),   # X tile
            pl.BlockSpec((tk, tn), lambda i, j, k: (k, j)),   # W^T tile
            pl.BlockSpec((1, tn), lambda i, j, k: (0, j)),    # bias tile (per N block)
        ],
        out_specs=pl.BlockSpec((tm, tn), lambda i, j, k: (i, j)),
        scratch_shapes=[pltpu.VMEM((tm, tn), jnp.float32)],
        compiler_params=pltpu.CompilerParams(
            dimension_semantics=("parallel", "parallel", "arbitrary"),
        ),
    )(x_p, wt_p, b_p)

    return out_p[:B, :O]


if __name__ == "__main__":
    key = jax.random.PRNGKey(0)
    kx, kw, kb = jax.random.split(key, 3)

    batch = 8
    input_size = 32
    output_size = 8

    # Deterministic "standardized" input (mimics StandardScaler output statistics).
    # TODO(synk): StandardScaler fit/transform is data preprocessing outside the module
    # forward; not re-implemented here.
    x = jax.random.normal(kx, (batch, input_size), dtype=jnp.float32)

    # Deterministic parameter init matching nn.Linear shapes: W (out, in), b (out,).
    bound = 1.0 / jnp.sqrt(input_size)
    w = jax.random.uniform(kw, (output_size, input_size), jnp.float32, -bound, bound)
    b = jax.random.uniform(kb, (output_size,), jnp.float32, -bound, bound)

    out = logistic_regression_forward(x, w, b)
    out = jax.block_until_ready(out)

    # Correctness check against plain JAX f32 reference (bf16 MXU inputs -> looser tol).
    ref = jax.nn.sigmoid(x @ w.T + b)
    assert out.shape == (batch, output_size)
    assert jnp.allclose(out, ref, atol=1e-2, rtol=1e-2), (
        f"max abs err = {jnp.max(jnp.abs(out - ref))}"
    )

    print("KERNEL_OK")
</pallas_src>

<mosaic_0001>
module attributes {stable_mosaic.version = 11 : i64} {
  func.func @logreg_kernel(%arg0: i32, %arg1: i32, %arg2: i32, %arg3: memref<8x128xf32, #tpu.memory_space<vmem>>, %arg4: memref<128x128xf32, #tpu.memory_space<vmem>>, %arg5: memref<1x128xf32, #tpu.memory_space<vmem>>, %arg6: memref<8x128xf32, #tpu.memory_space<vmem>>, %arg7: memref<8x128xf32, #tpu.memory_space<vmem>>) attributes {dimension_semantics = [#tpu.dimension_semantics<parallel>, #tpu.dimension_semantics<parallel>, #tpu.dimension_semantics<arbitrary>], iteration_bounds = array<i64: 1, 1, 1>, scalar_prefetch = 0 : i64, scratch_operands = 1 : i64, tpu.core_type = #tpu.core_type<tc>, window_params = [{transform_indices = @transform_0, window_bounds = array<i64: 8, 128>}, {transform_indices = @transform_1, window_bounds = array<i64: 128, 128>}, {transform_indices = @transform_2, window_bounds = array<i64: 1, 128>}, {transform_indices = @transform_3, window_bounds = array<i64: 8, 128>}]} {
    %c0_i32 = arith.constant 0 : i32
    %0 = arith.cmpi eq, %arg2, %c0_i32 : i32
    %1 = arith.extui %0 : i1 to i32
    %c0_i32_0 = arith.constant 0 : i32
    %2 = arith.cmpi ne, %1, %c0_i32_0 : i32
    scf.if %2 {
      %cst_10 = arith.constant 0.000000e+00 : f32
      %14 = vector.broadcast %cst_10 : f32 to vector<8x128xf32>
      %c0_11 = arith.constant 0 : index
      %c0_12 = arith.constant 0 : index
      %15 = vector.load %arg7[%c0_11, %c0_12] : memref<8x128xf32, #tpu.memory_space<vmem>>, vector<8x128xf32>
      tpu.vector_store %arg7[%c0_11, %c0_12], %14 {strides = array<i32>} : memref<8x128xf32, #tpu.memory_space<vmem>>, vector<8x128xf32>,
    } else {
    }
    %c0 = arith.constant 0 : index
    %c0_1 = arith.constant 0 : index
    %3 = vector.load %arg7[%c0, %c0_1] : memref<8x128xf32, #tpu.memory_space<vmem>>, vector<8x128xf32>
    %c0_2 = arith.constant 0 : index
    %c0_3 = arith.constant 0 : index
    %4 = vector.load %arg3[%c0_2, %c0_3] : memref<8x128xf32, #tpu.memory_space<vmem>>, vector<8x128xf32>
    %5 = arith.truncf %4 : vector<8x128xf32> to vector<8x128xbf16>
    %c0_4 = arith.constant 0 : index
    %c0_5 = arith.constant 0 : index
    %6 = vector.load %arg4[%c0_4, %c0_5] : memref<128x128xf32, #tpu.memory_space<vmem>>, vector<128x128xf32>
    %7 = arith.truncf %6 : vector<128x128xf32> to vector<128x128xbf16>
    %cst = arith.constant dense<0.000000e+00> : vector<8x128xf32>
    %8 = tpu.matmul %5, %7, %cst {dimension_numbers = #tpu.dot_dimension_numbers<[1], [0], [0], [1], [0, 0, 1, 1], [], []>} : vector<8x128xbf16>, vector<128x128xbf16>, vector<8x128xf32> -> vector<8x128xf32>
    %9 = arith.addf %3, %8 : vector<8x128xf32>
    %c0_6 = arith.constant 0 : index
    %c0_7 = arith.constant 0 : index
    %10 = vector.load %arg7[%c0_6, %c0_7] : memref<8x128xf32, #tpu.memory_space<vmem>>, vector<8x128xf32>
    tpu.vector_store %arg7[%c0_6, %c0_7], %9 {strides = array<i32>} : memref<8x128xf32, #tpu.memory_space<vmem>>, vector<8x128xf32>,
    %c0_i32_8 = arith.constant 0 : i32
    %11 = arith.cmpi eq, %arg2, %c0_i32_8 : i32
    %12 = arith.extui %11 : i1 to i32
    %c0_i32_9 = arith.constant 0 : i32
    %13 = arith.cmpi ne, %12, %c0_i32_9 : i32
    scf.if %13 {
      %c0_10 = arith.constant 0 : index
      %c0_11 = arith.constant 0 : index
      %14 = vector.load %arg7[%c0_10, %c0_11] : memref<8x128xf32, #tpu.memory_space<vmem>>, vector<8x128xf32>
      %c0_12 = arith.constant 0 : index
      %c0_13 = arith.constant 0 : index
      %15 = vector.load %arg5[%c0_12, %c0_13] : memref<1x128xf32, #tpu.memory_space<vmem>>, vector<1x128xf32>
      %16 = vector.broadcast %15 : vector<1x128xf32> to vector<8x128xf32>
      %17 = arith.addf %14, %16 : vector<8x128xf32>
      %18 = arith.negf %17 : vector<8x128xf32>
      %19 = math.exp %18 : vector<8x128xf32>
      %cst_14 = arith.constant 1.000000e+00 : f32
      %20 = vector.broadcast %cst_14 : f32 to vector<8x128xf32>
      %21 = arith.addf %20, %19 : vector<8x128xf32>
      %22 = arith.divf %20, %21 : vector<8x128xf32>
      %c0_15 = arith.constant 0 : index
      %c0_16 = arith.constant 0 : index
      %23 = vector.load %arg6[%c0_15, %c0_16] : memref<8x128xf32, #tpu.memory_space<vmem>>, vector<8x128xf32>
      tpu.vector_store %arg6[%c0_15, %c0_16], %22 {strides = array<i32>} : memref<8x128xf32, #tpu.memory_space<vmem>>, vector<8x128xf32>,
    } else {
    }
    return
  }
  func.func @transform_0(%arg0: i32, %arg1: i32, %arg2: i32) -> (i32, i32) {
    %c0_i32 = arith.constant 0 : i32
    return %arg0, %arg2 : i32, i32
  }
  func.func @transform_1(%arg0: i32, %arg1: i32, %arg2: i32) -> (i32, i32) {
    %c0_i32 = arith.constant 0 : i32
    return %arg2, %arg1 : i32, i32
  }
  func.func @transform_2(%arg0: i32, %arg1: i32, %arg2: i32) -> (i32, i32) {
    %c0_i32 = arith.constant 0 : i32
    %c0_i32_0 = arith.constant 0 : i32
    return %c0_i32, %arg1 : i32, i32
  }
  func.func @transform_3(%arg0: i32, %arg1: i32, %arg2: i32) -> (i32, i32) {
    %c0_i32 = arith.constant 0 : i32
    return %arg0, %arg1 : i32, i32
  }
}

</mosaic_0001>

<bundles_post_ra>
// kernel: logistic_regression_forward.1
= control target key start
LH: loop header
LB: loop body
LE: loop exit
PB: predicated region body
PF: predicated region fallthrough
CT: control target
= control target key end

     0   :  { %v183_v3 = vmov 0.0   ;;  %vm184_vm0 = vmmov 0   ;;  %s263_s0 = inlined_call_operand.vmem [shape: f32[8,128], index: 0, kind: input, shape index: {}]   ;;  %s264_s1 = inlined_call_operand.vmem [shape: f32[128,128], index: 1, kind: input, shape index: {}]   ;;  %s265_s2 = inlined_call_operand.vmem [shape: f32[1,128], index: 2, kind: input, shape index: {}]   ;;  %s266_s3 = inlined_call_operand.hbm [shape: f32[8,128], index: 3, kind: output, shape index: {}]  }
   0x1   :  { %v38_v0 = vld [vmem:[%s264_s1 + $0x70] sm:$0xff]  ;;  %v39_v1 = vld [vmem:[%s264_s1 + $0x78] sm:$0xff]  ;;  %v36_v2 = vld [vmem:[%s264_s1 + $0x60] sm:$0xff]  ;;  %134 = vmatprep.subr.bf16.mxu0 %v183_v3  ;;  %150 = vmatprep.mubr.msk.bf16.mxu0 %vm184_vm0, %v183_v3 }
   0x2   :  { %v47_v4 = vpack.c.bf16 %v39_v1, %v38_v0  ;;  %v37_v5 = vld [vmem:[%s264_s1 + $0x68] sm:$0xff]  ;;  %v34_v7 = vld [vmem:[%s264_s1 + $0x50] sm:$0xff]  ;;  %v35_v8 = vld [vmem:[%s264_s1 + $0x58] sm:$0xff] }
   0x3   :  { %v46_v6 = vpack.c.bf16 %v37_v5, %v36_v2 }
   0x4   :  { %135 = vmatpush3.bf16.msra.mxu0 %v47_v4 }
   0x5   :  { %136 = vmatprep.subr.bf16.mxu0 %v183_v3 }
   0x6   :  { %8 = vsyncpa [#allocation4], 0  ;;  %v45_v9 = vpack.c.bf16 %v35_v8, %v34_v7  ;;  %v32_v10 = vld [vmem:[%s264_s1 + $0x40] sm:$0xff]  ;;  %v33_v11 = vld [vmem:[%s264_s1 + $0x48] sm:$0xff] }
   0x7   :  { %v44_v12 = vpack.c.bf16 %v33_v11, %v32_v10  ;;  %v30_v13 = vld [vmem:[%s264_s1 + $0x30] sm:$0xff]  ;;  %v31_v14 = vld [vmem:[%s264_s1 + $0x38] sm:$0xff]  ;;  %v28_v16 = vld [vmem:[%s264_s1 + $0x20] sm:$0xff] }
   0x8   :  { %137 = vmatpush3.bf16.msra.mxu0 %v46_v6  ;;  %v43_v15 = vpack.c.bf16 %v31_v14, %v30_v13  ;;  %v29_v17 = vld [vmem:[%s264_s1 + $0x28] sm:$0xff]  ;;  %v26_v19 = vld [vmem:[%s264_s1 + $0x10] sm:$0xff]  ;;  %v27_v20 = vld [vmem:[%s264_s1 + $0x18] sm:$0xff] }
   0x9   :  { %138 = vmatprep.subr.bf16.mxu0 %v183_v3  ;;  %v42_v18 = vpack.c.bf16 %v29_v17, %v28_v16  ;;  %v41_v21 = vpack.c.bf16 %v27_v20, %v26_v19  ;;  %v24_v22 = vld [vmem:[%s264_s1] sm:$0xff]  ;;  %v25_v23 = vld [vmem:[%s264_s1 + $0x8] sm:$0xff]  ;;  %s185_s1 = smov [#allocation3]  }
   0xa   :  { %v40_v24 = vpack.c.bf16 %v25_v23, %v24_v22  ;;  %v22_v25 = vld [vmem:[%s263_s0] sm:$0xff]  ;;  %s115_s0 = sshll.u32 %s185_s1, 4  ;;  %s116_s0 = int_to_ptr.vmem [resolvable:$true] %s115_s0 }
   0xb   :  { %v23_v26 = vpack.c.bf16 %v22_v25, %v22_v25  ;;  %v123_v27 = vld [vmem:[%s265_s2] ss:$0 sm:$0xff]  ;;  %s161_s21 = scalar_lea.vmem %s116_s0, 128  ;;  %p166_p1 = scmp.lt.s32.totalorder %s116_s0, %s116_s0 }
   0xc   :  { %139 = vmatpush3.bf16.msra.mxu0 %v45_v9  ;;  %p162_p0 = scmp.ne.s32.totalorder %s116_s0, %s161_s21  ;;  %p167_p2 = scmp.lt.s32.totalorder %s161_s21, %s161_s21 }
   0xd   :  { %140 = vmatprep.subr.bf16.mxu0 %v183_v3 }
   0xe   :  { %p168_p3 = por %p167_p2, %p166_p1 }
  0x10   :  { %141 = vmatpush3.bf16.msra.mxu0 %v44_v12  ;;  %p169_p4 = pnand %p168_p3, %p162_p0 }
  0x11   :  { %142 = vmatprep.subr.bf16.mxu0 %v183_v3 }
  0x14   :  { %143 = vmatpush3.bf16.msra.mxu0 %v43_v15 }
  0x15   :  { %144 = vmatprep.subr.bf16.mxu0 %v183_v3 }
  0x18   :  { %145 = vmatpush3.bf16.msra.mxu0 %v42_v18 }
  0x19   :  { %146 = vmatprep.subr.bf16.mxu0 %v183_v3 }
  0x1c   :  { %147 = vmatpush3.bf16.msra.mxu0 %v41_v21 }
  0x1d   :  { %148 = vmatprep.subr.bf16.mxu0 %v183_v3 }
  0x20   :  { %149 = vmatpush3.bf16.msra.mxu0 %v40_v24 }
  0x23   :  { %151 = vmatmul.mubr.bf16.vlgmr.msra.gmra.mxu0 %v23_v26 }
  0xe3   :  { %v82_v28 = vpop.f32.mrf.mxu0 }
  0xe4   :  { %v101_v29 = vadd.f32 %v123_v27, %v82_v28 }
  0xe5   :  { %v152_v30 = vpop.f32.mrf.mxu0 }
  0xe6   :  { %v124_v31 = vmul.f32 -1.442695, %v101_v29 }
  0xe7   :  { %v85_v32 = vpop.f32.mrf.mxu0 }
  0xe8   :  { %157 = vpow2.f32 %v124_v31 }
  0xe9   :  { %v153_v33 = vpop.f32.mrf.mxu0 }
  0xf5   :  { %v158_v34 = vpop.eup %157 }
  0xf6   :  { %v105_v35 = vadd.f32 1.0, %v158_v34 }
  0xf8   :  { %159 = vrcp.f32 %v105_v35 }
 0x105   :  { %v160_v36 = vpop.eup %159 }
 0x106   :  { %108 = vst [vmem:[#allocation3] sm:$0xff] %v160_v36 }
 0x107   :  { %172 = shalt.err (!%p169_p4)
}
 0x108   :  { %118 = dma.vmem_to_hbm [thread:$0]  %s116_s0, 128, %s266_s3, [#allocation4]  }
 0x109   :  { %181 = dma.done.wait [#allocation4], 128  }
 0x10a   :  { %182 = vsyncadd [#allocation4], 4294967168 }
 0x10b   :  { %122 = vsyncpa [#allocation4], 1 }

</bundles_post_ra>
